<compile_context>
chip_gen: v7x
topology: tpu7x:2x2x1
jax: 0.10.0
libtpu: 0.0.40
codegen_flags: <defaults>
</compile_context>

<pallas_src>
import jax
import jax.numpy as jnp
from jax.experimental import pallas as pl
from jax.experimental.pallas import tpu as pltpu

LANE = 128


def _round_up(x, m):
    return ((x + m - 1) // m) * m


# ----------------------------- Pallas kernel --------------------------------

def _fused_gcn2_kernel(a_row_ref, a_col_ref, x_ref, w1_ref, b1_ref,
                       w2_ref, b2_ref, o_ref, xw1_ref):
    """Fused 2-layer GCN, K-tiled over node blocks.

    a_row_ref: [tk, Np]   bf16  A_hat row tile (layer-1 aggregation)
    a_col_ref: [Np, tk]   bf16  A_hat col tile (layer-2 aggregation)
    x_ref:     [Np, Fin_p] bf16 (resident: constant index map)
    w1_ref:    [Fin_p, H_p] bf16, b1_ref: [1, H_p] f32
    w2_ref:    [H_p, O_p]   bf16, b2_ref: [1, O_p] f32
    o_ref:     [Np, O_p]  f32   resident accumulator / output
    xw1_ref:   [Np, H_p]  bf16  VMEM scratch, X @ W1 computed once
    """
    k = pl.program_id(0)
    last = pl.num_programs(0) - 1

    @pl.when(k == 0)
    def _init():
        xw1 = jnp.dot(x_ref[...], w1_ref[...],
                      preferred_element_type=jnp.float32)
        xw1_ref[...] = xw1.astype(jnp.bfloat16)
        o_ref[...] = jnp.zeros_like(o_ref)

    # Layer 1 on this node block: h1_k = relu(A[k_blk, :] @ (X W1) + b1)
    h1 = jnp.dot(a_row_ref[...], xw1_ref[...],
                 preferred_element_type=jnp.float32)
    h1 = jnp.maximum(h1 + b1_ref[...], 0.0).astype(jnp.bfloat16)

    # Layer 2 partial product: out += A[:, k_blk] @ (h1_k @ W2)
    h1w2 = jnp.dot(h1, w2_ref[...],
                   preferred_element_type=jnp.float32).astype(jnp.bfloat16)
    o_ref[...] += jnp.dot(a_col_ref[...], h1w2,
                          preferred_element_type=jnp.float32)

    @pl.when(k == last)
    def _finalize():
        o_ref[...] += b2_ref[...]          # bias only in the epilogue


def gcn2_fused(a_hat, x, w1, b1, w2, b2):
    """Fused forward of a 2-layer GCN on a dense normalized adjacency."""
    n, f_in = x.shape
    hid = w1.shape[1]
    out = w2.shape[1]

    # Lane-dense padded dims.
    f_in_p = _round_up(f_in, LANE)
    hid_p = _round_up(hid, LANE)
    out_p = _round_up(out, LANE)

    # Node-block (reduction) tiling: single block while it trivially fits,
    # otherwise 256/512-wide K tiles sized against a ~16 MiB A-tile budget.
    n_p = _round_up(n, 8)
    if n_p <= 512:
        tk = n_p
    else:
        n_p = _round_up(n_p, 512)
        tk = 512
        while tk > 256 and 8 * tk * n_p > (16 << 20):  # row+col tiles, 2-buf, bf16
            tk -= 256
    num_k = n_p // tk

    f32, bf16 = jnp.float32, jnp.bfloat16
    a_p = jnp.zeros((n_p, n_p), bf16).at[:n, :n].set(a_hat.astype(bf16))
    x_p = jnp.zeros((n_p, f_in_p), bf16).at[:n, :f_in].set(x.astype(bf16))
    w1_p = jnp.zeros((f_in_p, hid_p), bf16).at[:f_in, :hid].set(w1.astype(bf16))
    b1_p = jnp.zeros((1, hid_p), f32).at[0, :hid].set(b1)
    w2_p = jnp.zeros((hid_p, out_p), bf16).at[:hid, :out].set(w2.astype(bf16))
    b2_p = jnp.zeros((1, out_p), f32).at[0, :out].set(b2)

    out_padded = pl.pallas_call(
        _fused_gcn2_kernel,
        out_shape=jax.ShapeDtypeStruct((n_p, out_p), f32),
        grid=(num_k,),
        in_specs=[
            pl.BlockSpec((tk, n_p), lambda k: (k, 0)),       # A row tile
            pl.BlockSpec((n_p, tk), lambda k: (0, k)),       # A col tile
            pl.BlockSpec((n_p, f_in_p), lambda k: (0, 0)),   # X (resident)
            pl.BlockSpec((f_in_p, hid_p), lambda k: (0, 0)),  # W1
            pl.BlockSpec((1, hid_p), lambda k: (0, 0)),       # b1
            pl.BlockSpec((hid_p, out_p), lambda k: (0, 0)),   # W2
            pl.BlockSpec((1, out_p), lambda k: (0, 0)),       # b2
        ],
        out_specs=pl.BlockSpec((n_p, out_p), lambda k: (0, 0)),
        scratch_shapes=[pltpu.VMEM((n_p, hid_p), bf16)],      # X @ W1
        compiler_params=pltpu.CompilerParams(
            dimension_semantics=("arbitrary",),               # k is a reduction
            vmem_limit_bytes=32 * 1024 * 1024),
    )(a_p, a_p, x_p, w1_p, b1_p, w2_p, b2_p)

    return out_padded[:n, :out]


# ------------------------------ glue (plain JAX) ------------------------------

def build_normalized_adjacency(edge_index, num_nodes):
    """A_hat = D^{-1/2} (A + I) D^{-1/2}, matching PyG GCNConv defaults.

    Duplicate edges are summed; existing self-loops are replaced by weight-1
    self-loops (add_remaining_self_loops semantics).
    """
    src = edge_index[0]
    dst = edge_index[1]
    w = jnp.where(src != dst, 1.0, 0.0).astype(jnp.float32)
    adj = jnp.zeros((num_nodes, num_nodes), jnp.float32).at[dst, src].add(w)
    adj = adj + jnp.eye(num_nodes, dtype=jnp.float32)         # self loops
    deg = adj.sum(axis=1)
    d_inv_sqrt = jnp.where(deg > 0, 1.0 / jnp.sqrt(deg), 0.0)
    return d_inv_sqrt[:, None] * adj * d_inv_sqrt[None, :]


def init_gcn_params(key, in_channels, hidden_channels, out_channels,
                    num_layers=2):
    """Deterministic Glorot-uniform weights + zero biases (GCNConv default)."""
    dims = [in_channels] + [hidden_channels] * (num_layers - 1) + [out_channels]
    params = []
    for layer in range(num_layers):
        f_in, f_out = dims[layer], dims[layer + 1]
        key, sub = jax.random.split(key)
        limit = jnp.sqrt(6.0 / (f_in + f_out))
        w = jax.random.uniform(sub, (f_in, f_out), jnp.float32, -limit, limit)
        b = jnp.zeros((f_out,), jnp.float32)
        params.append((w, b))
    return params


@jax.jit
def gcn_forward(x, edge_index, params):
    """Forward pass of a 2-layer GCN (eval mode: dropout is identity)."""
    assert len(params) == 2, "fused kernel implements the default 2-layer GCN"
    num_nodes = x.shape[0]
    a_hat = build_normalized_adjacency(edge_index, num_nodes)
    (w1, b1), (w2, b2) = params
    return gcn2_fused(a_hat, x, w1, b1, w2, b2)


def gcn_forward_ref(x, edge_index, params):
    """Pure-JAX f32 reference for a numerical sanity check."""
    a_hat = build_normalized_adjacency(edge_index, x.shape[0])
    h = x
    for w, b in params[:-1]:
        h = jnp.maximum(a_hat @ (h @ w) + b, 0.0)
    w, b = params[-1]
    return a_hat @ (h @ w) + b


# ----------------------------------- main ------------------------------------

if __name__ == "__main__":
    key = jax.random.PRNGKey(0)

    num_nodes = 32
    num_edges = 64
    in_channels = 16
    hidden_channels = 32
    out_channels = 8
    num_layers = 2

    k_x, k_e, k_p = jax.random.split(key, 3)
    x = jax.random.normal(k_x, (num_nodes, in_channels), jnp.float32)
    edge_index = jax.random.randint(
        k_e, (2, num_edges), 0, num_nodes, dtype=jnp.int32)

    params = init_gcn_params(k_p, in_channels, hidden_channels, out_channels,
                             num_layers=num_layers)

    out = gcn_forward(x, edge_index, params)
    out = jax.block_until_ready(out)

    assert out.shape == (num_nodes, out_channels)
    assert jnp.all(jnp.isfinite(out))

    # Loose tolerance: kernel uses bf16 MXU operands with f32 accumulation.
    ref = gcn_forward_ref(x, edge_index, params)
    rel_err = jnp.max(jnp.abs(out - ref)) / (jnp.max(jnp.abs(ref)) + 1e-6)
    assert float(rel_err) < 5e-2, f"relative error too large: {rel_err}"

    print("KERNEL_OK")
</pallas_src>

<mosaic_0001>
module attributes {stable_mosaic.version = 11 : i64} {
  func.func private @main(%arg0: i32) attributes {dimension_semantics = [#tpu.dimension_semantics<core_parallel>], iteration_bounds = array<i64: 2>, tpu.core_type = #tpu.core_type<sc_scalar_subcore>, window_params = []} {
    return
  }
}

module attributes {stable_mosaic.version = 11 : i64} {
  func.func private @main(%arg0: i32) attributes {dimension_semantics = [#tpu.dimension_semantics<core_parallel>], iteration_bounds = array<i64: 2>, tpu.core_type = #tpu.core_type<sc_scalar_subcore>, window_params = []} {
    return
  }
}

module attributes {stable_mosaic.version = 11 : i64} {
  func.func @_fused_gcn2_kernel(%arg0: i32, %arg1: memref<32x32xbf16, #tpu.memory_space<vmem>>, %arg2: memref<32x32xbf16, #tpu.memory_space<vmem>>, %arg3: memref<32x128xbf16, #tpu.memory_space<vmem>>, %arg4: memref<128x128xbf16, #tpu.memory_space<vmem>>, %arg5: memref<1x128xf32, #tpu.memory_space<vmem>>, %arg6: memref<128x128xbf16, #tpu.memory_space<vmem>>, %arg7: memref<1x128xf32, #tpu.memory_space<vmem>>, %arg8: memref<32x128xf32, #tpu.memory_space<vmem>>, %arg9: memref<32x128xbf16, #tpu.memory_space<vmem>>) attributes {dimension_semantics = [#tpu.dimension_semantics<arbitrary>], iteration_bounds = array<i64: 1>, scalar_prefetch = 0 : i64, scratch_operands = 1 : i64, tpu.core_type = #tpu.core_type<tc>, window_params = [{transform_indices = @transform_0, window_bounds = array<i64: 32, 32>}, {transform_indices = @transform_1, window_bounds = array<i64: 32, 32>}, {pipeline_mode = #tpu.pipeline_mode<synchronous>, transform_indices = @transform_2, window_bounds = array<i64: 32, 128>}, {pipeline_mode = #tpu.pipeline_mode<synchronous>, transform_indices = @transform_3, window_bounds = array<i64: 128, 128>}, {pipeline_mode = #tpu.pipeline_mode<synchronous>, transform_indices = @transform_4, window_bounds = array<i64: 1, 128>}, {pipeline_mode = #tpu.pipeline_mode<synchronous>, transform_indices = @transform_5, window_bounds = array<i64: 128, 128>}, {pipeline_mode = #tpu.pipeline_mode<synchronous>, transform_indices = @transform_6, window_bounds = array<i64: 1, 128>}, {pipeline_mode = #tpu.pipeline_mode<synchronous>, transform_indices = @transform_7, window_bounds = array<i64: 32, 128>}]} {
    %c0_i32 = arith.constant 0 : i32
    %0 = arith.cmpi eq, %arg0, %c0_i32 : i32
    %1 = arith.extui %0 : i1 to i32
    %c0_i32_0 = arith.constant 0 : i32
    %2 = arith.cmpi ne, %1, %c0_i32_0 : i32
    scf.if %2 {
      %c0_19 = arith.constant 0 : index
      %c0_20 = arith.constant 0 : index
      %23 = vector.load %arg3[%c0_19, %c0_20] : memref<32x128xbf16, #tpu.memory_space<vmem>>, vector<32x128xbf16>
      %c0_21 = arith.constant 0 : index
      %c0_22 = arith.constant 0 : index
      %24 = vector.load %arg4[%c0_21, %c0_22] : memref<128x128xbf16, #tpu.memory_space<vmem>>, vector<128x128xbf16>
      %cst_23 = arith.constant dense<0.000000e+00> : vector<32x128xf32>
      %25 = tpu.matmul %23, %24, %cst_23 {dimension_numbers = #tpu.dot_dimension_numbers<[1], [0], [0], [1], [0, 0, 1, 1], [], []>} : vector<32x128xbf16>, vector<128x128xbf16>, vector<32x128xf32> -> vector<32x128xf32>
      %26 = arith.truncf %25 : vector<32x128xf32> to vector<32x128xbf16>
      %c0_24 = arith.constant 0 : index
      %c0_25 = arith.constant 0 : index
      %27 = vector.load %arg9[%c0_24, %c0_25] : memref<32x128xbf16, #tpu.memory_space<vmem>>, vector<32x128xbf16>
      tpu.vector_store %arg9[%c0_24, %c0_25], %26 {strides = array<i32>} : memref<32x128xbf16, #tpu.memory_space<vmem>>, vector<32x128xbf16>,
      %cst_26 = arith.constant 0.000000e+00 : f32
      %28 = vector.broadcast %cst_26 : f32 to vector<32x128xf32>
      %c0_27 = arith.constant 0 : index
      %c0_28 = arith.constant 0 : index
      %29 = vector.load %arg8[%c0_27, %c0_28] : memref<32x128xf32, #tpu.memory_space<vmem>>, vector<32x128xf32>
      tpu.vector_store %arg8[%c0_27, %c0_28], %28 {strides = array<i32>} : memref<32x128xf32, #tpu.memory_space<vmem>>, vector<32x128xf32>,
    } else {
    }
    %c0 = arith.constant 0 : index
    %c0_1 = arith.constant 0 : index
    %3 = vector.load %arg1[%c0, %c0_1] : memref<32x32xbf16, #tpu.memory_space<vmem>>, vector<32x32xbf16>
    %c0_2 = arith.constant 0 : index
    %c0_3 = arith.constant 0 : index
    %4 = vector.load %arg9[%c0_2, %c0_3] : memref<32x128xbf16, #tpu.memory_space<vmem>>, vector<32x128xbf16>
    %cst = arith.constant dense<0.000000e+00> : vector<32x128xf32>
    %5 = tpu.matmul %3, %4, %cst {dimension_numbers = #tpu.dot_dimension_numbers<[1], [0], [0], [1], [0, 0, 1, 1], [], []>} : vector<32x32xbf16>, vector<32x128xbf16>, vector<32x128xf32> -> vector<32x128xf32>
    %c0_4 = arith.constant 0 : index
    %c0_5 = arith.constant 0 : index
    %6 = vector.load %arg5[%c0_4, %c0_5] : memref<1x128xf32, #tpu.memory_space<vmem>>, vector<1x128xf32>
    %7 = vector.broadcast %6 : vector<1x128xf32> to vector<32x128xf32>
    %8 = arith.addf %5, %7 : vector<32x128xf32>
    %cst_6 = arith.constant 0.000000e+00 : f32
    %9 = vector.broadcast %cst_6 : f32 to vector<32x128xf32>
    %10 = arith.maximumf %8, %9 : vector<32x128xf32>
    %11 = arith.truncf %10 : vector<32x128xf32> to vector<32x128xbf16>
    %c0_7 = arith.constant 0 : index
    %c0_8 = arith.constant 0 : index
    %12 = vector.load %arg6[%c0_7, %c0_8] : memref<128x128xbf16, #tpu.memory_space<vmem>>, vector<128x128xbf16>
    %cst_9 = arith.constant dense<0.000000e+00> : vector<32x128xf32>
    %13 = tpu.matmul %11, %12, %cst_9 {dimension_numbers = #tpu.dot_dimension_numbers<[1], [0], [0], [1], [0, 0, 1, 1], [], []>} : vector<32x128xbf16>, vector<128x128xbf16>, vector<32x128xf32> -> vector<32x128xf32>
    %14 = arith.truncf %13 : vector<32x128xf32> to vector<32x128xbf16>
    %c0_10 = arith.constant 0 : index
    %c0_11 = arith.constant 0 : index
    %15 = vector.load %arg8[%c0_10, %c0_11] : memref<32x128xf32, #tpu.memory_space<vmem>>, vector<32x128xf32>
    %c0_12 = arith.constant 0 : index
    %c0_13 = arith.constant 0 : index
    %16 = vector.load %arg2[%c0_12, %c0_13] : memref<32x32xbf16, #tpu.memory_space<vmem>>, vector<32x32xbf16>
    %cst_14 = arith.constant dense<0.000000e+00> : vector<32x128xf32>
    %17 = tpu.matmul %16, %14, %cst_14 {dimension_numbers = #tpu.dot_dimension_numbers<[1], [0], [0], [1], [0, 0, 1, 1], [], []>} : vector<32x32xbf16>, vector<32x128xbf16>, vector<32x128xf32> -> vector<32x128xf32>
    %18 = arith.addf %15, %17 : vector<32x128xf32>
    %c0_15 = arith.constant 0 : index
    %c0_16 = arith.constant 0 : index
    %19 = vector.load %arg8[%c0_15, %c0_16] : memref<32x128xf32, #tpu.memory_space<vmem>>, vector<32x128xf32>
    tpu.vector_store %arg8[%c0_15, %c0_16], %18 {strides = array<i32>} : memref<32x128xf32, #tpu.memory_space<vmem>>, vector<32x128xf32>,
    %c0_i32_17 = arith.constant 0 : i32
    %20 = arith.cmpi eq, %arg0, %c0_i32_17 : i32
    %21 = arith.extui %20 : i1 to i32
    %c0_i32_18 = arith.constant 0 : i32
    %22 = arith.cmpi ne, %21, %c0_i32_18 : i32
    scf.if %22 {
      %c0_19 = arith.constant 0 : index
      %c0_20 = arith.constant 0 : index
      %23 = vector.load %arg8[%c0_19, %c0_20] : memref<32x128xf32, #tpu.memory_space<vmem>>, vector<32x128xf32>
      %c0_21 = arith.constant 0 : index
      %c0_22 = arith.constant 0 : index
      %24 = vector.load %arg7[%c0_21, %c0_22] : memref<1x128xf32, #tpu.memory_space<vmem>>, vector<1x128xf32>
      %25 = vector.broadcast %24 : vector<1x128xf32> to vector<32x128xf32>
      %26 = arith.addf %23, %25 : vector<32x128xf32>
      %c0_23 = arith.constant 0 : index
      %c0_24 = arith.constant 0 : index
      %27 = vector.load %arg8[%c0_23, %c0_24] : memref<32x128xf32, #tpu.memory_space<vmem>>, vector<32x128xf32>
      tpu.vector_store %arg8[%c0_23, %c0_24], %26 {strides = array<i32>} : memref<32x128xf32, #tpu.memory_space<vmem>>, vector<32x128xf32>,
    } else {
    }
    return
  }
  func.func @transform_0(%arg0: i32) -> (i32, i32) {
    %c0_i32 = arith.constant 0 : i32
    %c0_i32_0 = arith.constant 0 : i32
    return %arg0, %c0_i32 : i32, i32
  }
  func.func @transform_1(%arg0: i32) -> (i32, i32) {
    %c0_i32 = arith.constant 0 : i32
    %c0_i32_0 = arith.constant 0 : i32
    return %c0_i32, %arg0 : i32, i32
  }
  func.func @transform_2(%arg0: i32) -> (i32, i32) {
    %c0_i32 = arith.constant 0 : i32
    %c0_i32_0 = arith.constant 0 : i32
    %c0_i32_1 = arith.constant 0 : i32
    return %c0_i32, %c0_i32_0 : i32, i32
  }
  func.func @transform_3(%arg0: i32) -> (i32, i32) {
    %c0_i32 = arith.constant 0 : i32
    %c0_i32_0 = arith.constant 0 : i32
    %c0_i32_1 = arith.constant 0 : i32
    return %c0_i32, %c0_i32_0 : i32, i32
  }
  func.func @transform_4(%arg0: i32) -> (i32, i32) {
    %c0_i32 = arith.constant 0 : i32
    %c0_i32_0 = arith.constant 0 : i32
    %c0_i32_1 = arith.constant 0 : i32
    return %c0_i32, %c0_i32_0 : i32, i32
  }
  func.func @transform_5(%arg0: i32) -> (i32, i32) {
    %c0_i32 = arith.constant 0 : i32
    %c0_i32_0 = arith.constant 0 : i32
    %c0_i32_1 = arith.constant 0 : i32
    return %c0_i32, %c0_i32_0 : i32, i32
  }
  func.func @transform_6(%arg0: i32) -> (i32, i32) {
    %c0_i32 = arith.constant 0 : i32
    %c0_i32_0 = arith.constant 0 : i32
    %c0_i32_1 = arith.constant 0 : i32
    return %c0_i32, %c0_i32_0 : i32, i32
  }
  func.func @transform_7(%arg0: i32) -> (i32, i32) {
    %c0_i32 = arith.constant 0 : i32
    %c0_i32_0 = arith.constant 0 : i32
    %c0_i32_1 = arith.constant 0 : i32
    return %c0_i32, %c0_i32_0 : i32, i32
  }
}

</mosaic_0001>

<bundles_post_ra>
// kernel: gcn_forward.1
= control target key start
LH: loop header
LB: loop body
LE: loop exit
PB: predicated region body
PF: predicated region fallthrough
CT: control target
= control target key end

     0   :  { %vm191_vm0 = vcmask 261120   ;;  %s738_s3 = inlined_call_operand.vmem [shape: bf16[128,128], index: 3, kind: input, shape index: {}]   ;;  %s739_s2 = inlined_call_operand.vmem [shape: bf16[32,128], index: 2, kind: input, shape index: {}]   ;;  %s740_s0 = inlined_call_operand.vmem [shape: bf16[32,32], index: 0, kind: input, shape index: {}, may-alias: {0,1}]   ;;  %s741_s5 = inlined_call_operand.vmem [shape: bf16[128,128], index: 5, kind: input, shape index: {}]   ;;  %s742_s4 = inlined_call_operand.vmem [shape: f32[1,128], index: 4, kind: input, shape index: {}]   ;;  %s743_s1 = inlined_call_operand.vmem [shape: bf16[32,32], index: 1, kind: input, shape index: {}, may-alias: {0,1}]   ;;  %s744_s6 = inlined_call_operand.vmem [shape: f32[1,128], index: 6, kind: input, shape index: {}]   ;;  %s745_s7 = inlined_call_operand.vmem [shape: f32[32,128], index: 7, kind: output, shape index: {}]  }
   0x1   :  { %v588_v0 = vld [vmem:[%s738_s3] sm:$0xff]   ;;  %v589_v1 = vld [vmem:[%s738_s3 + $0x8] sm:$0xff]   ;;  %v590_v2 = vld [vmem:[%s738_s3 + $0x10] sm:$0xff]  }
   0x2   :  { %531 = vmatprep.subr.bf16.mxu0 %v588_v0  ;;  %v591_v3 = vld [vmem:[%s738_s3 + $0x18] sm:$0xff]   ;;  %v596_v4 = vld [vmem:[%s739_s2] sm:$0xff]   ;;  %v593_v6 = vld [vmem:[%s738_s3 + $0x28] sm:$0xff]  }
   0x3   :  { %532 = vmatpush3.bf16.msra.mxu0 %v588_v0  ;;  %547 = vmatprep.mubr.bf16.mxu0 %v596_v4  ;;  %v592_v5 = vld [vmem:[%s738_s3 + $0x20] sm:$0xff]   ;;  %v594_v7 = vld [vmem:[%s738_s3 + $0x30] sm:$0xff]   ;;  %v595_v8 = vld [vmem:[%s738_s3 + $0x38] sm:$0xff]  }
   0x4   :  { %533 = vmatprep.subr.bf16.mxu0 %v589_v1  ;;  %v597_v9 = vld [vmem:[%s739_s2 + $0x8] sm:$0xff]   ;;  %v598_v10 = vld [vmem:[%s740_s0] sm:$0xff]   ;;  %v602_v20 = vld [vmem:[%s741_s5 + $0x10] sm:$0xff]  }
   0x5   :  { %555 = vmatprep.mubr.msk.bf16.mxu1 %vm191_vm0, %v598_v10  ;;  %v600_v17 = vld [vmem:[%s741_s5] sm:$0xff]   ;;  %v599_v18 = vld [vmem:[%s740_s0 + $0x8] sm:$0xff]   ;;  %v603_v21 = vld [vmem:[%s741_s5 + $0x18] sm:$0xff]  }
   0x6   :  { %v601_v19 = vld [vmem:[%s741_s5 + $0x8] sm:$0xff]   ;;  %v604_v22 = vld [vmem:[%s741_s5 + $0x20] sm:$0xff]   ;;  %v606_v24 = vld [vmem:[%s741_s5 + $0x30] sm:$0xff]  }
   0x7   :  { %534 = vmatpush3.bf16.msra.mxu0 %v589_v1  ;;  %v605_v23 = vld [vmem:[%s741_s5 + $0x28] sm:$0xff]   ;;  %v607_v25 = vld [vmem:[%s741_s5 + $0x38] sm:$0xff]   ;;  %v485_v26 = vld [vmem:[%s742_s4] ss:$0 sm:$0xff] }
   0x8   :  { %535 = vmatprep.subr.bf16.mxu0 %v590_v2  ;;  %v608_v41 = vld [vmem:[%s743_s1] sm:$0xff]   ;;  %v609_v48 = vld [vmem:[%s743_s1 + $0x8] sm:$0xff]  }
   0x9   :  { %v502_v50 = vld [vmem:[%s744_s6] ss:$0 sm:$0xff] }
   0xb   :  { %536 = vmatpush3.bf16.msra.mxu0 %v590_v2 }
   0xc   :  { %537 = vmatprep.subr.bf16.mxu0 %v591_v3 }
   0xf   :  { %538 = vmatpush3.bf16.msra.mxu0 %v591_v3 }
  0x10   :  { %539 = vmatprep.subr.bf16.mxu0 %v592_v5 }
  0x13   :  { %540 = vmatpush3.bf16.msra.mxu0 %v592_v5 }
  0x14   :  { %541 = vmatprep.subr.bf16.mxu0 %v593_v6 }
  0x17   :  { %542 = vmatpush3.bf16.msra.mxu0 %v593_v6 }
  0x18   :  { %543 = vmatprep.subr.bf16.mxu0 %v594_v7 }
  0x1b   :  { %544 = vmatpush3.bf16.msra.mxu0 %v594_v7 }
  0x1c   :  { %545 = vmatprep.subr.bf16.mxu0 %v595_v8 }
  0x1f   :  { %546 = vmatpush3.bf16.msra.mxu0 %v595_v8 }
  0x22   :  { %548 = vmatmul.mubr.bf16.vlgmr.msra.gmra.mrb[0].mxu0 %v597_v9 }
  0x23   :  { %583 = vmatprep.mubr.msk.bf16.mxu0 %vm191_vm0, %v608_v41 }
  0xf5   :  { %v549_v11 = vpop.f32.mrb[0].mxu0 }
  0xf6   :  { %v145_v12 = vpop.f32.mrb[1].mxu0 }
  0xf7   :  { %v550_v13 = vpop.f32.mrb[2].mxu0 }
  0xf8   :  { %v161_v14 = vpack.c.bf16 %v550_v13, %v549_v11  ;;  %v148_v15 = vpop.f32.mrb[3].mxu0 }
  0xf9   :  { %v160_v16 = vpack.c.bf16 %v148_v15, %v145_v12 }
  0xfb   :  { %551 = vmatprep.subr.bf16.mxu1 %v160_v16 }
  0xfc   :  { %552 = vmatpush3.bf16.msra.mxu1 %v160_v16 }
  0xfd   :  { %553 = vmatprep.subr.bf16.mxu1 %v161_v14 }
 0x100   :  { %554 = vmatpush3.bf16.msra.mxu1 %v161_v14 }
 0x101   :  { %559 = vmatprep.subr.bf16.mxu1 %v600_v17 }
 0x103   :  { %556 = vmatmul.mubr.msk.bf16.vlgmr.msra.gmra.mrb[0].mxu1 %vm191_vm0, %v599_v18 }
 0x104   :  { %560 = vmatpush3.bf16.msra.mxu1 %v600_v17 }
 0x105   :  { %561 = vmatprep.subr.bf16.mxu1 %v601_v19 }
 0x108   :  { %562 = vmatpush3.bf16.msra.mxu1 %v601_v19 }
 0x109   :  { %563 = vmatprep.subr.bf16.mxu1 %v602_v20 }
 0x10c   :  { %564 = vmatpush3.bf16.msra.mxu1 %v602_v20 }
 0x10d   :  { %565 = vmatprep.subr.bf16.mxu1 %v603_v21 }
 0x110   :  { %566 = vmatpush3.bf16.msra.mxu1 %v603_v21 }
 0x111   :  { %567 = vmatprep.subr.bf16.mxu1 %v604_v22 }
 0x114   :  { %568 = vmatpush3.bf16.msra.mxu1 %v604_v22 }
 0x115   :  { %569 = vmatprep.subr.bf16.mxu1 %v605_v23 }
 0x118   :  { %570 = vmatpush3.bf16.msra.mxu1 %v605_v23 }
 0x119   :  { %571 = vmatprep.subr.bf16.mxu1 %v606_v24 }
 0x11c   :  { %572 = vmatpush3.bf16.msra.mxu1 %v606_v24 }
 0x11d   :  { %573 = vmatprep.subr.bf16.mxu1 %v607_v25 }
 0x120   :  { %574 = vmatpush3.bf16.msra.mxu1 %v607_v25 }
 0x1d6   :  { %v557_v27 = vpop.f32.mrb[0].mxu1 }
 0x1d7   :  { %v241_v28 = vadd.f32 %v557_v27, %v485_v26  ;;  %v232_v29 = vpop.f32.mrb[1].mxu1 }
 0x1d8   :  { %v233_v30 = vadd.f32 %v485_v26, %v232_v29  ;;  %v558_v31 = vpop.f32.mrb[2].mxu1 }
 0x1d9   :  { %v244_v32 = vadd.f32 %v558_v31, %v485_v26  ;;  %v235_v33 = vpop.f32.mrb[3].mxu1  ;;  %v249_v35 = vmax.f32 %v241_v28, 0.0 }
 0x1da   :  { %v236_v34 = vadd.f32 %v485_v26, %v235_v33  ;;  %v247_v37 = vmax.f32 %v233_v30, 0.0 }
 0x1db   :  { %v250_v36 = vmax.f32 %v244_v32, 0.0 }
 0x1dc   :  { %v248_v38 = vmax.f32 %v236_v34, 0.0 }
 0x1dd   :  { %v252_v39 = vpack.c.bf16 %v250_v36, %v249_v35 }
 0x1de   :  { %v251_v40 = vpack.c.bf16 %v248_v38, %v247_v37 }
 0x1e0   :  { %575 = vmatprep.mubr.bf16.mxu1 %v251_v40 }
 0x1e1   :  { %576 = vmatmul.mubr.bf16.vlgmr.msra.gmra.mrb[4].mxu1 %v252_v39 }
 0x2b4   :  { %v577_v42 = vpop.f32.mrb[4].mxu1 }
 0x2b5   :  { %v351_v43 = vpop.f32.mrb[5].mxu1 }
 0x2b6   :  { %v578_v44 = vpop.f32.mrb[6].mxu1 }
 0x2b7   :  { %v367_v45 = vpack.c.bf16 %v578_v44, %v577_v42  ;;  %v354_v46 = vpop.f32.mrb[7].mxu1 }
 0x2b8   :  { %v366_v47 = vpack.c.bf16 %v354_v46, %v351_v43 }
 0x2ba   :  { %579 = vmatprep.subr.bf16.mxu0 %v366_v47 }
 0x2bb   :  { %580 = vmatpush3.bf16.msra.mxu0 %v366_v47 }
 0x2bc   :  { %581 = vmatprep.subr.bf16.mxu0 %v367_v45 }
 0x2bf   :  { %582 = vmatpush3.bf16.msra.mxu0 %v367_v45 }
 0x2c2   :  { %584 = vmatmul.mubr.msk.bf16.vlgmr.msra.gmra.mrb[4].mxu0 %vm191_vm0, %v609_v48 }
 0x395   :  { %v585_v49 = vpop.f32.mrb[4].mxu0 }
 0x396   :  { %v426_v51 = vpop.f32.mrb[5].mxu0  ;;  %v465_v53 = vadd.f32 %v585_v49, %v502_v50 }
 0x397   :  { %v586_v52 = vpop.f32.mrb[6].mxu0  ;;  %v463_v55 = vadd.f32 %v502_v50, %v426_v51 }
 0x398   :  { %v429_v54 = vpop.f32.mrb[7].mxu0  ;;  %469 = vst [vmem:[%s745_s7 + $0x10] sm:$0xff] %v465_v53  ;;  %v466_v56 = vadd.f32 %v586_v52, %v502_v50 }
 0x399   :  { %467 = vst [vmem:[%s745_s7] sm:$0xff] %v463_v55  ;;  %v464_v57 = vadd.f32 %v502_v50, %v429_v54 }
 0x39a   :  { %470 = vst [vmem:[%s745_s7 + $0x18] sm:$0xff] %v466_v56 }
 0x39b   :  { %468 = vst [vmem:[%s745_s7 + $0x8] sm:$0xff] %v464_v57 }

</bundles_post_ra>
